<compile_context>
chip_gen: v6e
topology: v6e:2x2x1
jax: 0.10.0
libtpu: 0.0.40
codegen_flags: <defaults>
</compile_context>

<pallas_src>
import jax
import jax.numpy as jnp
from jax.experimental import pallas as pl
from jax.experimental.pallas import tpu as pltpu


def chatbot_mlp_kernel(x_ref, w1_ref, b1_ref, w2_ref, b2_ref, w3_ref, b3_ref,
                       out_ref):
    """One batch tile of the fused 3-layer MLP forward.

    x_ref:   (TB, D_in)        f32 activations (cast to bf16 in-kernel)
    w*_ref:  bf16 weights (in, out); w2/w3 pre-padded to 128-wide hidden,
             w3 lane-padded to a multiple of 128 output columns
    b*_ref:  (1, out) f32 biases (b2/b3 pre-padded)
    out_ref: (TB, OUT_PAD)     bf16 padded logits
    """
    x = x_ref[...].astype(jnp.bfloat16)                                # in-kernel cast

    # fc1 + ReLU (dropout = identity in eval mode); f32 accumulation.
    h1 = jnp.dot(x, w1_ref[...], preferred_element_type=jnp.float32)   # (TB,128)
    h1 = jnp.maximum(h1 + b1_ref[...], 0.0)

    # fc2 + ReLU (hidden padded 64->128; padded lanes stay exactly 0).
    h2 = jnp.dot(h1.astype(jnp.bfloat16), w2_ref[...],
                 preferred_element_type=jnp.float32)                   # (TB,128)
    h2 = jnp.maximum(h2 + b2_ref[...], 0.0)

    # fc3 (logits, lane-padded output columns; zero w3 rows cancel the h2 pad).
    h3 = jnp.dot(h2.astype(jnp.bfloat16), w3_ref[...],
                 preferred_element_type=jnp.float32)                   # (TB,OUT_PAD)
    out_ref[...] = (h3 + b3_ref[...]).astype(out_ref.dtype)


def init_params(key, input_size, output_size):
    """Deterministic synthetic f32 parameters with the shapes from __init__.

    Stored transposed relative to PyTorch: (in, out) for row-major matmul.
    """
    k1, k2, k3, k4, k5, k6 = jax.random.split(key, 6)
    w1 = jax.random.normal(k1, (input_size, 128), jnp.float32) * 0.05
    b1 = jax.random.normal(k2, (1, 128), jnp.float32) * 0.05
    w2 = jax.random.normal(k3, (128, 64), jnp.float32) * 0.05
    b2 = jax.random.normal(k4, (1, 64), jnp.float32) * 0.05
    w3 = jax.random.normal(k5, (64, output_size), jnp.float32) * 0.05
    b3 = jax.random.normal(k6, (1, output_size), jnp.float32) * 0.05
    return (w1, b1, w2, b2, w3, b3)


def prep_params(params):
    """One-time parameter preparation (do this at init, NOT per forward call).

    - pads the 64-wide hidden dim to 128 (w2 cols, b2, w3 rows) with zeros
    - pads fc3 output columns up to a multiple of 128 (lane-dense output)
    - casts matmul weights to bf16; biases stay f32 for the epilogue
    """
    w1, b1, w2, b2, w3, b3 = params
    hid2, out_dim = w3.shape
    hid2_pad = pl.cdiv(hid2, 128) * 128
    out_pad = pl.cdiv(out_dim, 128) * 128

    w2p = jnp.zeros((w2.shape[0], hid2_pad), w2.dtype).at[:, :hid2].set(w2)
    b2p = jnp.zeros((1, hid2_pad), b2.dtype).at[:, :hid2].set(b2)
    w3p = jnp.zeros((hid2_pad, out_pad), w3.dtype).at[:hid2, :out_dim].set(w3)
    b3p = jnp.zeros((1, out_pad), b3.dtype).at[:, :out_dim].set(b3)

    prepped = (w1.astype(jnp.bfloat16), b1,
               w2p.astype(jnp.bfloat16), b2p,
               w3p.astype(jnp.bfloat16), b3p)
    # Materialize now so none of this runs on the forward path.
    prepped = jax.tree_util.tree_map(jax.block_until_ready, prepped)
    return prepped, out_dim


def _pick_tile_b(batch):
    """Amortize ~0.35us/grid-step overhead; keep >=2 steps for v7x megacore."""
    if batch <= 128:
        return max(8, pl.cdiv(batch, 8) * 8)          # single step, sublane-aligned
    # >=2 grid steps (both v7x TensorCores busy), tiles capped at 512 rows.
    return min(512, pl.cdiv(batch, 2 * 128) * 128)


def chatbot_mlp_forward(x, prepped, out_dim, *, tile_b=None, return_padded=False):
    """Pallas wrapper: batch-tiled grid, resident pre-prepped weights."""
    w1b, b1, w2b, b2p, w3b, b3p = prepped
    batch, d_in = x.shape
    out_pad = w3b.shape[1]

    if tile_b is None:
        tile_b = _pick_tile_b(batch)
    padded_b = pl.cdiv(batch, tile_b) * tile_b
    xp = x if padded_b == batch else jnp.pad(x, ((0, padded_b - batch), (0, 0)))

    grid = (padded_b // tile_b,)

    out = pl.pallas_call(
        chatbot_mlp_kernel,
        out_shape=jax.ShapeDtypeStruct((padded_b, out_pad), jnp.bfloat16),
        grid=grid,
        in_specs=[
            pl.BlockSpec((tile_b, d_in), lambda i: (i, 0)),   # x: tiled on batch
            pl.BlockSpec(w1b.shape, lambda i: (0, 0)),        # weights/biases:
            pl.BlockSpec(b1.shape, lambda i: (0, 0)),         # same block every
            pl.BlockSpec(w2b.shape, lambda i: (0, 0)),        # step -> resident
            pl.BlockSpec(b2p.shape, lambda i: (0, 0)),        # in VMEM
            pl.BlockSpec(w3b.shape, lambda i: (0, 0)),
            pl.BlockSpec(b3p.shape, lambda i: (0, 0)),
        ],
        out_specs=pl.BlockSpec((tile_b, out_pad), lambda i: (i, 0)),
        compiler_params=pltpu.CompilerParams(
            dimension_semantics=("parallel",)),               # 2 TCs on v7x
    )(xp, w1b, b1, w2b, b2p, w3b, b3p)

    if return_padded:
        # NOTE: padded rows/cols contain garbage (bias propagation); caller
        # must ignore rows >= batch and cols >= out_dim.
        return out
    return out[:batch, :out_dim]


def reference_forward(x, params):
    """Pure-JAX f32 reference (eval-mode dropout = identity)."""
    w1, b1, w2, b2, w3, b3 = params
    h = jnp.maximum(x @ w1 + b1, 0.0)
    h = jnp.maximum(h @ w2 + b2, 0.0)
    return h @ w3 + b3


if __name__ == "__main__":
    input_size = 32      # e.g. bag-of-words vocab size for the chatbot intents
    output_size = 10     # number of intent classes
    batch = 256          # enough rows per call to actually fill the MXU

    key = jax.random.PRNGKey(0)
    kx, kp = jax.random.split(key)
    x = jax.random.normal(kx, (batch, input_size), jnp.float32)
    params = init_params(kp, input_size, output_size)

    # One-time prep (padding + bf16 casts) done OUTSIDE the forward path.
    prepped, out_dim = prep_params(params)

    out = chatbot_mlp_forward(x, prepped, out_dim)
    out = jax.block_until_ready(out)

    ref = reference_forward(x, params)
    assert out.shape == (batch, output_size), out.shape
    # bf16 matmul inputs + bf16 output with f32 accumulation -> loose tolerance.
    max_err = float(jnp.max(jnp.abs(out.astype(jnp.float32) - ref)))
    assert max_err < 3e-2, max_err

    print("KERNEL_OK")
</pallas_src>

<mosaic_0001>
module attributes {stable_mosaic.version = 11 : i64} {
  func.func @chatbot_mlp_kernel(%arg0: i32, %arg1: memref<128x32xf32, #tpu.memory_space<vmem>>, %arg2: memref<32x128xbf16, #tpu.memory_space<vmem>>, %arg3: memref<1x128xf32, #tpu.memory_space<vmem>>, %arg4: memref<128x128xbf16, #tpu.memory_space<vmem>>, %arg5: memref<1x128xf32, #tpu.memory_space<vmem>>, %arg6: memref<128x128xbf16, #tpu.memory_space<vmem>>, %arg7: memref<1x128xf32, #tpu.memory_space<vmem>>, %arg8: memref<128x128xbf16, #tpu.memory_space<vmem>>) attributes {dimension_semantics = [#tpu.dimension_semantics<parallel>], iteration_bounds = array<i64: 2>, scalar_prefetch = 0 : i64, scratch_operands = 0 : i64, tpu.core_type = #tpu.core_type<tc>, window_params = [{transform_indices = @transform_0, window_bounds = array<i64: 128, 32>}, {pipeline_mode = #tpu.pipeline_mode<synchronous>, transform_indices = @transform_1, window_bounds = array<i64: 32, 128>}, {pipeline_mode = #tpu.pipeline_mode<synchronous>, transform_indices = @transform_2, window_bounds = array<i64: 1, 128>}, {pipeline_mode = #tpu.pipeline_mode<synchronous>, transform_indices = @transform_3, window_bounds = array<i64: 128, 128>}, {pipeline_mode = #tpu.pipeline_mode<synchronous>, transform_indices = @transform_4, window_bounds = array<i64: 1, 128>}, {pipeline_mode = #tpu.pipeline_mode<synchronous>, transform_indices = @transform_5, window_bounds = array<i64: 128, 128>}, {pipeline_mode = #tpu.pipeline_mode<synchronous>, transform_indices = @transform_6, window_bounds = array<i64: 1, 128>}, {transform_indices = @transform_7, window_bounds = array<i64: 128, 128>}]} {
    %c0 = arith.constant 0 : index
    %c0_0 = arith.constant 0 : index
    %0 = vector.load %arg1[%c0, %c0_0] : memref<128x32xf32, #tpu.memory_space<vmem>>, vector<128x32xf32>
    %1 = arith.truncf %0 : vector<128x32xf32> to vector<128x32xbf16>
    %c0_1 = arith.constant 0 : index
    %c0_2 = arith.constant 0 : index
    %2 = vector.load %arg2[%c0_1, %c0_2] : memref<32x128xbf16, #tpu.memory_space<vmem>>, vector<32x128xbf16>
    %cst = arith.constant dense<0.000000e+00> : vector<128x128xf32>
    %3 = tpu.matmul %1, %2, %cst {dimension_numbers = #tpu.dot_dimension_numbers<[1], [0], [0], [1], [0, 0, 1, 1], [], []>} : vector<128x32xbf16>, vector<32x128xbf16>, vector<128x128xf32> -> vector<128x128xf32>
    %c0_3 = arith.constant 0 : index
    %c0_4 = arith.constant 0 : index
    %4 = vector.load %arg3[%c0_3, %c0_4] : memref<1x128xf32, #tpu.memory_space<vmem>>, vector<1x128xf32>
    %5 = vector.broadcast %4 : vector<1x128xf32> to vector<128x128xf32>
    %6 = arith.addf %3, %5 : vector<128x128xf32>
    %cst_5 = arith.constant 0.000000e+00 : f32
    %7 = vector.broadcast %cst_5 : f32 to vector<128x128xf32>
    %8 = arith.maximumf %6, %7 : vector<128x128xf32>
    %9 = arith.truncf %8 : vector<128x128xf32> to vector<128x128xbf16>
    %c0_6 = arith.constant 0 : index
    %c0_7 = arith.constant 0 : index
    %10 = vector.load %arg4[%c0_6, %c0_7] : memref<128x128xbf16, #tpu.memory_space<vmem>>, vector<128x128xbf16>
    %cst_8 = arith.constant dense<0.000000e+00> : vector<128x128xf32>
    %11 = tpu.matmul %9, %10, %cst_8 {dimension_numbers = #tpu.dot_dimension_numbers<[1], [0], [0], [1], [0, 0, 1, 1], [], []>} : vector<128x128xbf16>, vector<128x128xbf16>, vector<128x128xf32> -> vector<128x128xf32>
    %c0_9 = arith.constant 0 : index
    %c0_10 = arith.constant 0 : index
    %12 = vector.load %arg5[%c0_9, %c0_10] : memref<1x128xf32, #tpu.memory_space<vmem>>, vector<1x128xf32>
    %13 = vector.broadcast %12 : vector<1x128xf32> to vector<128x128xf32>
    %14 = arith.addf %11, %13 : vector<128x128xf32>
    %cst_11 = arith.constant 0.000000e+00 : f32
    %15 = vector.broadcast %cst_11 : f32 to vector<128x128xf32>
    %16 = arith.maximumf %14, %15 : vector<128x128xf32>
    %17 = arith.truncf %16 : vector<128x128xf32> to vector<128x128xbf16>
    %c0_12 = arith.constant 0 : index
    %c0_13 = arith.constant 0 : index
    %18 = vector.load %arg6[%c0_12, %c0_13] : memref<128x128xbf16, #tpu.memory_space<vmem>>, vector<128x128xbf16>
    %cst_14 = arith.constant dense<0.000000e+00> : vector<128x128xf32>
    %19 = tpu.matmul %17, %18, %cst_14 {dimension_numbers = #tpu.dot_dimension_numbers<[1], [0], [0], [1], [0, 0, 1, 1], [], []>} : vector<128x128xbf16>, vector<128x128xbf16>, vector<128x128xf32> -> vector<128x128xf32>
    %c0_15 = arith.constant 0 : index
    %c0_16 = arith.constant 0 : index
    %20 = vector.load %arg7[%c0_15, %c0_16] : memref<1x128xf32, #tpu.memory_space<vmem>>, vector<1x128xf32>
    %21 = vector.broadcast %20 : vector<1x128xf32> to vector<128x128xf32>
    %22 = arith.addf %19, %21 : vector<128x128xf32>
    %23 = arith.truncf %22 : vector<128x128xf32> to vector<128x128xbf16>
    %c0_17 = arith.constant 0 : index
    %c0_18 = arith.constant 0 : index
    %24 = vector.load %arg8[%c0_17, %c0_18] : memref<128x128xbf16, #tpu.memory_space<vmem>>, vector<128x128xbf16>
    tpu.vector_store %arg8[%c0_17, %c0_18], %23 {strides = array<i32>} : memref<128x128xbf16, #tpu.memory_space<vmem>>, vector<128x128xbf16>,
    return
  }
  func.func @transform_0(%arg0: i32) -> (i32, i32) {
    %c0_i32 = arith.constant 0 : i32
    %c0_i32_0 = arith.constant 0 : i32
    return %arg0, %c0_i32 : i32, i32
  }
  func.func @transform_1(%arg0: i32) -> (i32, i32) {
    %c0_i32 = arith.constant 0 : i32
    %c0_i32_0 = arith.constant 0 : i32
    %c0_i32_1 = arith.constant 0 : i32
    return %c0_i32, %c0_i32_0 : i32, i32
  }
  func.func @transform_2(%arg0: i32) -> (i32, i32) {
    %c0_i32 = arith.constant 0 : i32
    %c0_i32_0 = arith.constant 0 : i32
    %c0_i32_1 = arith.constant 0 : i32
    return %c0_i32, %c0_i32_0 : i32, i32
  }
  func.func @transform_3(%arg0: i32) -> (i32, i32) {
    %c0_i32 = arith.constant 0 : i32
    %c0_i32_0 = arith.constant 0 : i32
    %c0_i32_1 = arith.constant 0 : i32
    return %c0_i32, %c0_i32_0 : i32, i32
  }
  func.func @transform_4(%arg0: i32) -> (i32, i32) {
    %c0_i32 = arith.constant 0 : i32
    %c0_i32_0 = arith.constant 0 : i32
    %c0_i32_1 = arith.constant 0 : i32
    return %c0_i32, %c0_i32_0 : i32, i32
  }
  func.func @transform_5(%arg0: i32) -> (i32, i32) {
    %c0_i32 = arith.constant 0 : i32
    %c0_i32_0 = arith.constant 0 : i32
    %c0_i32_1 = arith.constant 0 : i32
    return %c0_i32, %c0_i32_0 : i32, i32
  }
  func.func @transform_6(%arg0: i32) -> (i32, i32) {
    %c0_i32 = arith.constant 0 : i32
    %c0_i32_0 = arith.constant 0 : i32
    %c0_i32_1 = arith.constant 0 : i32
    return %c0_i32, %c0_i32_0 : i32, i32
  }
  func.func @transform_7(%arg0: i32) -> (i32, i32) {
    %c0_i32 = arith.constant 0 : i32
    %c0_i32_0 = arith.constant 0 : i32
    return %arg0, %c0_i32 : i32, i32
  }
}

</mosaic_0001>

<bundles_post_ra>
// kernel: tpu_custom_call.1
= control target key start
LH: loop header
LB: loop body
LE: loop exit
PB: predicated region body
PF: predicated region fallthrough
CT: control target
= control target key end

     0   :  { %12 = vsyncpa [#allocation3], 0  ;;  %s1606_s0 = inlined_call_operand.vmem [shape: f32[256,32], index: 0, kind: input, shape index: {}]   ;;  %s1607_s1 = inlined_call_operand.vmem [shape: bf16[32,128], index: 1, kind: input, shape index: {}]   ;;  %s1608_s2 = inlined_call_operand.vmem [shape: f32[1,128], index: 2, kind: input, shape index: {}]   ;;  %s1609_s3 = inlined_call_operand.vmem [shape: bf16[128,128], index: 3, kind: input, shape index: {}]   ;;  %s1610_s4 = inlined_call_operand.vmem [shape: f32[1,128], index: 4, kind: input, shape index: {}]   ;;  %s1611_s5 = inlined_call_operand.vmem [shape: bf16[128,128], index: 5, kind: input, shape index: {}]   ;;  %s1612_s6 = inlined_call_operand.vmem [shape: f32[1,128], index: 6, kind: input, shape index: {}]   ;;  %s1613_s7 = inlined_call_operand.hbm [shape: bf16[256,128], index: 7, kind: output, shape index: {}]  }
   0x1   :  { %14 = vsyncpa [#allocation3 + $0x1], 0  ;;  %s1401_s24 = smov 0   ;;  %s1403_s25 = smov 0  }
   0x2   :  { %s1405_s26 = smov 0   ;;  %s1407_s27 = smov 0  }
   0x3 LB: > { %s1422_s28 = sadd.s32 4294967295, %s1356_s27   ;;  %s990_s29 = sadd.s32 4294967294, %s1356_s27   ;;  %s1356_s27 = sphi %s1407_s27, %s1619_s27   ;;  %s1352_s26 = sphi %s1405_s26, %s1618_s26   ;;  %s1348_s25 = sphi %s1403_s25, %s1617_s25   ;;  %s1344_s24 = sphi %s1401_s24, %s1616_s24  }
   0x4   : > { %s1426_s30 = sadd.s32 1, %s1356_s27   ;;  %s179_s8 = sadd.s32 1, %s1352_s26 }
   0x5   : > { %s176_s9 = ssub.s32 %s1356_s27, %s1426_s30  ;;  %p189_p0 = scmp.ne.s32.totalorder %s1352_s26, %s1348_s25 }
   0x6   : > { %p177_p1 = scmp.eq.s32.totalorder %s176_s9, 0  ;;  %p190_p2 = scmp.eq.s32.totalorder %s1422_s28, 1 }
   0x7   : > { %p195_p3 = scmp.ne.s32.totalorder %s1348_s25, %s1344_s24  ;;  %p196_p4 = scmp.eq.s32.totalorder %s990_s29, 1 }
   0x8   : > { %s1437_s10 = scalar_select %p177_p1, %s1352_s26, %s179_s8  }
   0x9   : > { %p1439_p5 = por %p190_p2, %p189_p0  ;;  %p1443_p6 = por %p196_p4, %p195_p3 }
   0xa   : > { %p993_p7 = scmp.ge.s32.totalorder %s1356_s27, 1  ;;  %p241_p8 = scmp.lt.s32.totalorder %s1356_s27, 3 }
   0xc   : > { %p242_p9 = pnand %p993_p7, %p241_p8 }
   0xd   : > { %s995_s15 = sshll.u32 (!%p242_p9), %s1422_s28, 4  ;;  %s270_s16 = sand.u32 (!%p242_p9), 1, %s1348_s25  }
   0xe   : > { %245 = sbr.rel (%p242_p9) target bundleno = 681 (0x2a9), region = 48  ;;  %p274_p10 = scmp.lt.s32.totalorder (!%p242_p9), %s995_s15, 31 }
   0xf   : > { %s994_s19 = sshll.u32 (!%p242_p9), %s270_s16, 6  ;;  %s1063_s21 = sshll.u32 (!%p242_p9), %s1422_s28, 10 }
  0x10   : > { %s1545_s20 = scalar_lea.vmem (!%p242_p9), [#allocation2], %s994_s19  ;;  %s1566_s28 = scalar_lea.sflag (!%p242_p9), [#allocation3], %s270_s16 }
  0x11   : > { %s1358_s13 = smov (!%p242_p9), [#allocation2]  }
  0x12   : > { %s1300_s14 = sshll.u32 (!%p242_p9), %s1358_s13, 4  ;;  %s1301_s14 = int_to_ptr.vmem [resolvable:$false] %s1300_s14 }
  0x13   : > { %v1278_v0 = vld [vmem:[%s1607_s1 + $0x8] sm:$0xff]   ;;  %v1279_v1 = vld [vmem:[%s1607_s1] sm:$0xff]   ;;  %v1280_v2 = vld [vmem:[%s1609_s3 + $0x38] sm:$0xff]   ;;  %s1621_s15 = smov (!%p274_p10, %s995_s15), 31  ;;  %vm328_vm0 = vcmask 261120  }
  0x14   : > { %1153 = vmatprep.subr.bf16.mxu0 %v1278_v0  ;;  %v1281_v3 = vld [vmem:[%s1609_s3 + $0x30] sm:$0xff]   ;;  %1173 = vmatprep.subr.bf16.mxu1 %v1280_v2  ;;  %s996_s22 = sshll.u32 %s1621_s15, 3  ;;  %v1282_v4 = vld [vmem:[%s1609_s3 + $0x28] sm:$0xff]   ;;  %v1283_v14 = vld [vmem:[%s1609_s3 + $0x20] sm:$0xff]   ;;  %s1302_s15 = scalar_lea.vmem %s1301_s14, 2048 }
  0x15   : > { %1154 = vmatpush3.bf16.msra.mxu0 %v1278_v0  ;;  %1174 = vmatpush3.bf16.msra.mxu1 %v1280_v2  ;;  %s1465_s8 = scalar_lea.vmem %s1606_s0, %s996_s22  ;;  %v1284_v19 = vld [vmem:[%s1609_s3 + $0x18] sm:$0xff]   ;;  %v1285_v31 = vld [vmem:[%s1609_s3 + $0x10] sm:$0xff]   ;;  %v1286_v32 = vld [vmem:[%s1609_s3 + $0x8] sm:$0xff]   ;;  %s928_s22 = sshll.u32 %s1545_s20, 4  ;;  %s1560_s22 = int_to_ptr.vmem [resolvable:$true] %s928_s22 }
  0x16   : > { %1155 = vmatprep.subr.bf16.mxu0 %v1279_v1  ;;  %1175 = vmatprep.subr.bf16.mxu1 %v1281_v3  ;;  %v281_v5 = vld [vmem:[%s1465_s8] sm:$0xff]  ;;  %v282_v6 = vld [vmem:[%s1465_s8 + $0x8] sm:$0xff]  ;;  %v283_v7 = vld [vmem:[%s1465_s8 + $0x10] sm:$0xff]  ;;  %s1296_s9 = scalar_lea.vmem %s1560_s22, 1024  ;;  %p1303_p0 = scmp.lt.s32.totalorder %s1560_s22, %s1301_s14 }
  0x17   : > { %v297_v8 = vpack.c.bf16 %v282_v6, %v281_v5  ;;  %v284_v9 = vld [vmem:[%s1465_s8 + $0x18] sm:$0xff]  ;;  %v285_v10 = vld [vmem:[%s1465_s8 + $0x20] sm:$0xff]  ;;  %v286_v11 = vld [vmem:[%s1465_s8 + $0x28] sm:$0xff]  ;;  %p1297_p11 = scmp.ne.s32.totalorder %s1560_s22, %s1296_s9  ;;  %p1304_p1 = scmp.lt.s32.totalorder %s1302_s15, %s1296_s9 }
  0x18   : > { %v298_v12 = vpack.c.bf16 %v284_v9, %v283_v7  ;;  %v299_v13 = vpack.c.bf16 %v286_v11, %v285_v10  ;;  %v287_v15 = vld [vmem:[%s1465_s8 + $0x30] sm:$0xff]  ;;  %v288_v16 = vld [vmem:[%s1465_s8 + $0x38] sm:$0xff]  ;;  %v289_v17 = vld [vmem:[%s1465_s8 + $0x40] sm:$0xff] }
  0x19   : > { %1156 = vmatpush3.bf16.msra.mxu0 %v1279_v1  ;;  %1176 = vmatpush3.bf16.msra.mxu1 %v1281_v3  ;;  %v290_v18 = vld [vmem:[%s1465_s8 + $0x48] sm:$0xff]  ;;  %v300_v20 = vpack.c.bf16 %v288_v16, %v287_v15  ;;  %v291_v22 = vld [vmem:[%s1465_s8 + $0x50] sm:$0xff]  ;;  %v292_v23 = vld [vmem:[%s1465_s8 + $0x58] sm:$0xff]  ;;  %p1298_p12 = pnand %p1297_p11, %p1439_p5  ;;  %p1305_p2 = por %p1304_p1, %p1303_p0 }
  0x1a   : > { %1157 = vmatprep.mubr.msk.bf16.mxu0 %vm328_vm0, %v297_v8  ;;  %1177 = vmatprep.subr.bf16.mxu1 %v1282_v4  ;;  %v301_v21 = vpack.c.bf16 %v290_v18, %v289_v17  ;;  %v293_v24 = vld [vmem:[%s1465_s8 + $0x60] sm:$0xff]  ;;  %v294_v25 = vld [vmem:[%s1465_s8 + $0x68] sm:$0xff]  ;;  %v302_v26 = vpack.c.bf16 %v292_v23, %v291_v22  ;;  %v295_v28 = vld [vmem:[%s1465_s8 + $0x70] sm:$0xff] }
  0x1b   : > { %v303_v27 = vpack.c.bf16 %v294_v25, %v293_v24  ;;  %v296_v29 = vld [vmem:[%s1465_s8 + $0x78] sm:$0xff]  ;;  %v1287_v33 = vld [vmem:[%s1609_s3] sm:$0xff]   ;;  %v1289_v35 = vld [vmem:[%s1611_s5 + $0x30] sm:$0xff]   ;;  %s1558_s8 = scalar_lea.hbm %s1613_s7, %s1063_s21  ;;  %p1299_p13 = pneg %p1298_p12 }
  0x1c   : > { %1158 = vmatmul.mubr.msk.bf16.vlgmr.msra.gmra.mxu0 %vm328_vm0, %v298_v12  ;;  %v304_v30 = vpack.c.bf16 %v296_v29, %v295_v28  ;;  %v1288_v34 = vld [vmem:[%s1611_s5 + $0x38] sm:$0xff]   ;;  %v1290_v36 = vld [vmem:[%s1611_s5 + $0x28] sm:$0xff]   ;;  %v1291_v37 = vld [vmem:[%s1611_s5 + $0x20] sm:$0xff]  }
  0x1d   : > { %1161 = vmatprep.mubr.msk.bf16.mxu0 %vm328_vm0, %v299_v13  ;;  %1178 = vmatpush3.bf16.msra.mxu1 %v1282_v4  ;;  %v1292_v38 = vld [vmem:[%s1611_s5 + $0x18] sm:$0xff]   ;;  %v997_v41 = vld [vmem:[%s1608_s2] ss:$0 sm:$0xff]  ;;  %p1306_p3 = pnand %p1305_p2, %p1299_p13 }
  0x1e   : > { %1179 = vmatprep.subr.bf16.mxu1 %v1283_v14  ;;  %1205 = vmatprep.subr.bf16.mxu0 %v1288_v34 }
  0x1f   : > { %1206 = vmatpush3.bf16.msra.mxu0 %v1288_v34  ;;  %v1295_v34 = vld [vmem:[%s1611_s5] sm:$0xff]  }
  0x20   : > { %1207 = vmatprep.subr.bf16.mxu0 %v1289_v35 }
  0x21   : > { %1180 = vmatpush3.bf16.msra.mxu1 %v1283_v14 }
  0x22   : > { %1181 = vmatprep.subr.bf16.mxu1 %v1284_v19 }
  0x23   : > { %1208 = vmatpush3.bf16.msra.mxu0 %v1289_v35 }
  0x24   : > { %1162 = vmatmul.mubr.msk.bf16.gmra.mxu0 %vm328_vm0, %v300_v20  ;;  %1209 = vmatprep.subr.bf16.mxu0 %v1290_v36 }
  0x25   : > { %1165 = vmatprep.mubr.msk.bf16.mxu0 %vm328_vm0, %v301_v21  ;;  %1182 = vmatpush3.bf16.msra.mxu1 %v1284_v19 }
  0x26   : > { %1183 = vmatprep.subr.bf16.mxu1 %v1285_v31 }
  0x27   : > { %1210 = vmatpush3.bf16.msra.mxu0 %v1290_v36 }
  0x28   : > { %1211 = vmatprep.subr.bf16.mxu0 %v1291_v37 }
  0x29   : > { %1184 = vmatpush3.bf16.msra.mxu1 %v1285_v31 }
  0x2a   : > { %1185 = vmatprep.subr.bf16.mxu1 %v1286_v32 }
  0x2b   : > { %1212 = vmatpush3.bf16.msra.mxu0 %v1291_v37  ;;  %v1008_v37 = vld [vmem:[%s1610_s4] ss:$0 sm:$0xff] }
  0x2c   : > { %1166 = vmatmul.mubr.msk.bf16.gmra.mxu0 %vm328_vm0, %v302_v26  ;;  %1213 = vmatprep.subr.bf16.mxu0 %v1292_v38 }
  0x2d   : > { %1169 = vmatprep.mubr.msk.bf16.mxu0 %vm328_vm0, %v303_v27  ;;  %1186 = vmatpush3.bf16.msra.mxu1 %v1286_v32  ;;  %v1293_v32 = vld [vmem:[%s1611_s5 + $0x10] sm:$0xff]  }
  0x2e   : > { %1187 = vmatprep.subr.bf16.mxu1 %v1287_v33 }
  0x2f   : > { %1214 = vmatpush3.bf16.msra.mxu0 %v1292_v38 }
  0x30   : > { %1215 = vmatprep.subr.bf16.mxu0 %v1293_v32 }
  0x31   : > { %1188 = vmatpush3.bf16.msra.mxu1 %v1287_v33  ;;  %v1294_v33 = vld [vmem:[%s1611_s5 + $0x8] sm:$0xff]  }
  0x33   : > { %1216 = vmatpush3.bf16.msra.mxu0 %v1293_v32 }
  0x34   : > { %1170 = vmatmul.mubr.msk.bf16.gmra.mxu0 %vm328_vm0, %v304_v30  ;;  %1217 = vmatprep.subr.bf16.mxu0 %v1294_v33 }
  0x37   : > { %1218 = vmatpush3.bf16.msra.mxu0 %v1294_v33 }
  0x38   : > { %1219 = vmatprep.subr.bf16.mxu0 %v1295_v34 }
  0x3b   : > { %1220 = vmatpush3.bf16.msra.mxu0 %v1295_v34 }
  0xdc   : > { %v1159_v39 = vpop.f32.mrf.mxu0 }
  0xdd   : > { %v396_v45 = vadd.f32 %v1159_v39, %v997_v41 }
  0xde   : > { %v387_v40 = vpop.f32.mrf.mxu0 }
  0xdf   : > { %v388_v43 = vadd.f32 %v997_v41, %v387_v40  ;;  %v452_v52 = vmax.f32 %v396_v45, 0.0 }
  0xe0   : > { %v1160_v42 = vpop.f32.mrf.mxu0 }
  0xe1   : > { %v399_v44 = vadd.f32 %v1160_v42, %v997_v41  ;;  %v450_v50 = vmax.f32 %v388_v43, 0.0 }
  0xe2   : > { %v390_v46 = vpop.f32.mrf.mxu0 }
  0xe3   : > { %v391_v47 = vadd.f32 %v997_v41, %v390_v46  ;;  %v453_v48 = vmax.f32 %v399_v44, 0.0 }
  0xe4   : > { %v1163_v49 = vpop.f32.mrf.mxu0 }
  0xe5   : > { %v451_v51 = vmax.f32 %v391_v47, 0.0  ;;  %v467_v55 = vpack.c.bf16 %v453_v48, %v452_v52  ;;  %v412_v59 = vadd.f32 %v1163_v49, %v997_v41 }
  0xe6   : > { %v403_v53 = vpop.f32.mrf.mxu0 }
  0xe7   : > { %v466_v54 = vpack.c.bf16 %v451_v51, %v450_v50  ;;  %v404_v57 = vadd.f32 %v997_v41, %v403_v53  ;;  %v456_v2 = vmax.f32 %v412_v59, 0.0 }
  0xe8   : > { %v1164_v56 = vpop.f32.mrf.mxu0 }
  0xe9   : > { %v415_v58 = vadd.f32 %v1164_v56, %v997_v41  ;;  %1189 = vmatprep.mubr.bf16.mxu1 %v466_v54  ;;  %v454_v0 = vmax.f32 %v404_v57, 0.0 }
  0xea   : > { %v406_v60 = vpop.f32.mrf.mxu0  ;;  %1190 = vmatmul.mubr.bf16.vlgmr.msra.gmra.mxu1 %v467_v55 }
  0xeb   : > { %v407_v61 = vadd.f32 %v997_v41, %v406_v60  ;;  %v457_v62 = vmax.f32 %v415_v58, 0.0 }
  0xec   : > { %v1167_v63 = vpop.f32.mrf.mxu0 }
  0xed   : > { %v455_v1 = vmax.f32 %v407_v61, 0.0  ;;  %v469_v5 = vpack.c.bf16 %v457_v62, %v456_v2  ;;  %v428_v9 = vadd.f32 %v1167_v63, %v997_v41 }
  0xee   : > { %v419_v3 = vpop.f32.mrf.mxu0 }
  0xef   : > { %v468_v4 = vpack.c.bf16 %v455_v1, %v454_v0  ;;  %v420_v7 = vadd.f32 %v997_v41, %v419_v3  ;;  %v460_v16 = vmax.f32 %v428_v9, 0.0 }
  0xf0   : > { %v1168_v6 = vpop.f32.mrf.mxu0 }
  0xf1   : > { %v431_v8 = vadd.f32 %v1168_v6, %v997_v41  ;;  %1193 = vmatprep.mubr.bf16.mxu1 %v468_v4  ;;  %v458_v14 = vmax.f32 %v420_v7, 0.0 }
  0xf2   : > { %v422_v10 = vpop.f32.mrf.mxu0  ;;  %1194 = vmatmul.mubr.bf16.gmra.mxu1 %v469_v5 }
  0xf3   : > { %v423_v11 = vadd.f32 %v997_v41, %v422_v10  ;;  %v461_v12 = vmax.f32 %v431_v8, 0.0 }
  0xf4   : > { %v1171_v13 = vpop.f32.mrf.mxu0 }
  0xf5   : > { %v459_v15 = vmax.f32 %v423_v11, 0.0  ;;  %v471_v19 = vpack.c.bf16 %v461_v12, %v460_v16  ;;  %v444_v23 = vadd.f32 %v1171_v13, %v997_v41 }
  0xf6   : > { %v435_v17 = vpop.f32.mrf.mxu0 }
  0xf7   : > { %v470_v18 = vpack.c.bf16 %v459_v15, %v458_v14  ;;  %v436_v21 = vadd.f32 %v997_v41, %v435_v17  ;;  %v464_v29 = vmax.f32 %v444_v23, 0.0 }
  0xf8   : > { %v1172_v20 = vpop.f32.mrf.mxu0 }
  0xf9   : > { %v447_v22 = vadd.f32 %v1172_v20, %v997_v41  ;;  %1197 = vmatprep.mubr.bf16.mxu1 %v470_v18  ;;  %v462_v27 = vmax.f32 %v436_v21, 0.0 }
  0xfa   : > { %v438_v24 = vpop.f32.mrf.mxu0  ;;  %1198 = vmatmul.mubr.bf16.gmra.mxu1 %v471_v19 }
  0xfb   : > { %v439_v25 = vadd.f32 %v997_v41, %v438_v24  ;;  %v465_v26 = vmax.f32 %v447_v22, 0.0 }
  0xfd   : > { %v463_v28 = vmax.f32 %v439_v25, 0.0  ;;  %v473_v31 = vpack.c.bf16 %v465_v26, %v464_v29  ;;  %v1017_v29 = vld [vmem:[%s1612_s6] ss:$0 sm:$0xff] }
  0xff   : > { %v472_v30 = vpack.c.bf16 %v463_v28, %v462_v27 }
 0x101   : > { %1201 = vmatprep.mubr.bf16.mxu1 %v472_v30 }
 0x102   : > { %1202 = vmatmul.mubr.bf16.gmra.mxu1 %v473_v31 }
 0x1aa   : > { %v1191_v35 = vpop.f32.mrf.mxu1 }
 0x1ab   : > { %v588_v41 = vadd.f32 %v1191_v35, %v1008_v37 }
 0x1ac   : > { %v579_v36 = vpop.f32.mrf.mxu1 }
 0x1ad   : > { %v580_v39 = vadd.f32 %v1008_v37, %v579_v36  ;;  %v644_v48 = vmax.f32 %v588_v41, 0.0 }
 0x1ae   : > { %v1192_v38 = vpop.f32.mrf.mxu1 }
 0x1af   : > { %v591_v40 = vadd.f32 %v1192_v38, %v1008_v37  ;;  %v642_v46 = vmax.f32 %v580_v39, 0.0 }
 0x1b0   : > { %v582_v42 = vpop.f32.mrf.mxu1 }
 0x1b1   : > { %v583_v43 = vadd.f32 %v1008_v37, %v582_v42  ;;  %v645_v44 = vmax.f32 %v591_v40, 0.0 }
 0x1b2   : > { %v1195_v45 = vpop.f32.mrf.mxu1 }
 0x1b3   : > { %v643_v47 = vmax.f32 %v583_v43, 0.0  ;;  %v659_v51 = vpack.c.bf16 %v645_v44, %v644_v48  ;;  %v604_v55 = vadd.f32 %v1195_v45, %v1008_v37 }
 0x1b4   : > { %v595_v49 = vpop.f32.mrf.mxu1 }
 0x1b5   : > { %v658_v50 = vpack.c.bf16 %v643_v47, %v642_v46  ;;  %v596_v53 = vadd.f32 %v1008_v37, %v595_v49  ;;  %v648_v62 = vmax.f32 %v604_v55, 0.0 }
 0x1b6   : > { %v1196_v52 = vpop.f32.mrf.mxu1 }
 0x1b7   : > { %v607_v54 = vadd.f32 %v1196_v52, %v1008_v37  ;;  %1221 = vmatprep.mubr.bf16.mxu0 %v658_v50  ;;  %v646_v60 = vmax.f32 %v596_v53, 0.0 }
 0x1b8   : > { %v598_v56 = vpop.f32.mrf.mxu1  ;;  %1222 = vmatmul.mubr.bf16.vlgmr.msra.gmra.mxu0 %v659_v51 }
 0x1b9   : > { %v599_v57 = vadd.f32 %v1008_v37, %v598_v56  ;;  %v649_v58 = vmax.f32 %v607_v54, 0.0 }
 0x1ba   : > { %v1199_v59 = vpop.f32.mrf.mxu1 }
 0x1bb   : > { %v647_v61 = vmax.f32 %v599_v57, 0.0  ;;  %v661_v1 = vpack.c.bf16 %v649_v58, %v648_v62  ;;  %v620_v5 = vadd.f32 %v1199_v59, %v1008_v37 }
 0x1bc   : > { %v611_v63 = vpop.f32.mrf.mxu1 }
 0x1bd   : > { %v660_v0 = vpack.c.bf16 %v647_v61, %v646_v60  ;;  %v612_v3 = vadd.f32 %v1008_v37, %v611_v63  ;;  %v652_v12 = vmax.f32 %v620_v5, 0.0 }
 0x1be   : > { %v1200_v2 = vpop.f32.mrf.mxu1 }
 0x1bf   : > { %v623_v4 = vadd.f32 %v1200_v2, %v1008_v37  ;;  %1225 = vmatprep.mubr.bf16.mxu0 %v660_v0  ;;  %v650_v10 = vmax.f32 %v612_v3, 0.0 }
 0x1c0   : > { %v614_v6 = vpop.f32.mrf.mxu1  ;;  %1226 = vmatmul.mubr.bf16.gmra.mxu0 %v661_v1 }
 0x1c1   : > { %v615_v7 = vadd.f32 %v1008_v37, %v614_v6  ;;  %v653_v8 = vmax.f32 %v623_v4, 0.0 }
 0x1c2   : > { %v1203_v9 = vpop.f32.mrf.mxu1 }
 0x1c3   : > { %v651_v11 = vmax.f32 %v615_v7, 0.0  ;;  %v663_v15 = vpack.c.bf16 %v653_v8, %v652_v12  ;;  %v636_v19 = vadd.f32 %v1203_v9, %v1008_v37 }
 0x1c4   : > { %v627_v13 = vpop.f32.mrf.mxu1 }
 0x1c5   : > { %v662_v14 = vpack.c.bf16 %v651_v11, %v650_v10  ;;  %v628_v17 = vadd.f32 %v1008_v37, %v627_v13  ;;  %v656_v25 = vmax.f32 %v636_v19, 0.0 }
 0x1c6   : > { %v1204_v16 = vpop.f32.mrf.mxu1 }
 0x1c7   : > { %v639_v18 = vadd.f32 %v1204_v16, %v1008_v37  ;;  %1229 = vmatprep.mubr.bf16.mxu0 %v662_v14  ;;  %v654_v23 = vmax.f32 %v628_v17, 0.0 }
 0x1c8   : > { %v630_v20 = vpop.f32.mrf.mxu1  ;;  %1230 = vmatmul.mubr.bf16.gmra.mxu0 %v663_v15 }
 0x1c9   : > { %v631_v21 = vadd.f32 %v1008_v37, %v630_v20  ;;  %v657_v22 = vmax.f32 %v639_v18, 0.0 }
 0x1cb   : > { %v655_v24 = vmax.f32 %v631_v21, 0.0  ;;  %v665_v27 = vpack.c.bf16 %v657_v22, %v656_v25 }
 0x1cd   : > { %v664_v26 = vpack.c.bf16 %v655_v24, %v654_v23 }
 0x1cf   : > { %1233 = vmatprep.mubr.bf16.mxu0 %v664_v26 }
 0x1d0   : > { %1234 = vmatmul.mubr.bf16.gmra.mxu0 %v665_v27 }
 0x278   : > { %v1223_v28 = vpop.f32.mrf.mxu0 }
 0x279   : > { %v780_v32 = vadd.f32 %v1223_v28, %v1017_v29 }
 0x27a   : > { %v771_v30 = vpop.f32.mrf.mxu0 }
 0x27b   : > { %v772_v35 = vadd.f32 %v1017_v29, %v771_v30 }
 0x27c   : > { %v1224_v31 = vpop.f32.mrf.mxu0 }
 0x27d   : > { %v783_v33 = vadd.f32 %v1224_v31, %v1017_v29 }
 0x27e   : > { %v774_v34 = vpop.f32.mrf.mxu0 }
 0x27f   : > { %v1072_v36 = vpack.c.bf16 %v783_v33, %v780_v32  ;;  %v775_v37 = vadd.f32 %v1017_v29, %v774_v34 }
 0x280   : > { %v1227_v38 = vpop.f32.mrf.mxu0 }
 0x281   : > { %1104 = vst [vmem:[%s1545_s20 + $0x8] sm:$0xff] %v1072_v36   ;;  %v1067_v39 = vpack.c.bf16 %v775_v37, %v772_v35  ;;  %v796_v42 = vadd.f32 %v1227_v38, %v1017_v29 }
 0x282   : > { %v787_v40 = vpop.f32.mrf.mxu0 }
 0x283   : > { %1068 = vst [vmem:[%s1545_s20] sm:$0xff] %v1067_v39   ;;  %v788_v45 = vadd.f32 %v1017_v29, %v787_v40 }
 0x284   : > { %v1228_v41 = vpop.f32.mrf.mxu0 }
 0x285   : > { %v799_v43 = vadd.f32 %v1228_v41, %v1017_v29 }
 0x286   : > { %v790_v44 = vpop.f32.mrf.mxu0 }
 0x287   : > { %v1082_v46 = vpack.c.bf16 %v799_v43, %v796_v42  ;;  %v791_v47 = vadd.f32 %v1017_v29, %v790_v44 }
 0x288   : > { %v1231_v48 = vpop.f32.mrf.mxu0 }
 0x289   : > { %1106 = vst [vmem:[%s1545_s20 + $0x18] sm:$0xff] %v1082_v46   ;;  %v1077_v49 = vpack.c.bf16 %v791_v47, %v788_v45  ;;  %v812_v52 = vadd.f32 %v1231_v48, %v1017_v29 }
 0x28a   : > { %v803_v50 = vpop.f32.mrf.mxu0 }
 0x28b   : > { %1105 = vst [vmem:[%s1545_s20 + $0x10] sm:$0xff] %v1077_v49   ;;  %v804_v55 = vadd.f32 %v1017_v29, %v803_v50 }
 0x28c   : > { %v1232_v51 = vpop.f32.mrf.mxu0 }
 0x28d   : > { %v815_v53 = vadd.f32 %v1232_v51, %v1017_v29 }
 0x28e   : > { %v806_v54 = vpop.f32.mrf.mxu0 }
 0x28f   : > { %v1092_v56 = vpack.c.bf16 %v815_v53, %v812_v52  ;;  %v807_v57 = vadd.f32 %v1017_v29, %v806_v54 }
 0x290   : > { %v1235_v58 = vpop.f32.mrf.mxu0 }
 0x291   : > { %1108 = vst [vmem:[%s1545_s20 + $0x28] sm:$0xff] %v1092_v56   ;;  %v1087_v59 = vpack.c.bf16 %v807_v57, %v804_v55  ;;  %v828_v62 = vadd.f32 %v1235_v58, %v1017_v29 }
 0x292   : > { %v819_v60 = vpop.f32.mrf.mxu0 }
 0x293   : > { %1107 = vst [vmem:[%s1545_s20 + $0x20] sm:$0xff] %v1087_v59   ;;  %v820_v1 = vadd.f32 %v1017_v29, %v819_v60 }
 0x294   : > { %v1236_v61 = vpop.f32.mrf.mxu0 }
 0x295   : > { %v831_v63 = vadd.f32 %v1236_v61, %v1017_v29 }
 0x296   : > { %v822_v0 = vpop.f32.mrf.mxu0 }
 0x297   : > { %v1102_v2 = vpack.c.bf16 %v831_v63, %v828_v62  ;;  %v823_v3 = vadd.f32 %v1017_v29, %v822_v0 }
 0x299   : > { %1110 = vst [vmem:[%s1545_s20 + $0x38] sm:$0xff] %v1102_v2   ;;  %v1097_v4 = vpack.c.bf16 %v823_v3, %v820_v1 }
 0x29b   : > { %1109 = vst [vmem:[%s1545_s20 + $0x30] sm:$0xff] %v1097_v4  }
 0x29c   : > { %1309 = shalt.err (!%p1306_p3)
}
 0x29d   : > { %s1310_s16 = scalar_lea.hbm %s1558_s8, 1024  ;;  %s1314_s19 = scalar_lea.hbm %s1613_s7, 2048 }
 0x29e   : > { %p1311_p4 = scmp.ne.s32.totalorder %s1558_s8, %s1310_s16  ;;  %p1315_p9 = scmp.lt.s32.totalorder %s1558_s8, %s1613_s7 }
 0x29f   : > { %p1316_p10 = scmp.lt.s32.totalorder %s1314_s19, %s1310_s16 }
 0x2a0   : > { %p1312_p7 = pnand %p1311_p4, %p1439_p5 }
 0x2a1   : > { %p1317_p11 = por %p1316_p10, %p1315_p9 }
 0x2a2   : > { %p1313_p8 = pneg %p1312_p7 }
 0x2a4   : > { %p1318_p12 = pnand %p1317_p11, %p1313_p8 }
 0x2a6   : > { %1321 = shalt.err (!%p1318_p12)
}
 0x2a7   : > { %s1359_s23 = smov 64   ;;  %s1360_s29 = smov 4  }
 0x2a8   : > { %1237 = dma.vmem_to_hbm [thread:$0]  (%p1439_p5), %s1560_s22, 1024, %s1558_s8, %s1566_s28, %s1359_s23, %s1359_s23, %s1360_s29  }
 0x2a9 PF: > { %p1243_p13 = scmp.ge.s32.totalorder %s1356_s27, 2  ;;  %s943_s9 = sand.u32 1, %s1344_s24  }
 0x2aa   : > { %s944_s13 = scalar_lea.sflag [#allocation3], %s943_s9 }
 0x2ab   : > { %p1240_p0 = pnand %p1243_p13, %p1443_p6 }
 0x2ad   : > { %p1241_p1 = pneg %p1240_p0 }
 0x2af   : > { %1339 = dma.done.wait (%p1241_p1), %s944_s13, 1024  }
 0x2b0   : > { %1341 = vsyncadd (%p1241_p1), %s944_s13, 4294966272  ;;  %p17_p2 = scmp.ge.s32.totalorder %s1426_s30, 4   ;;  %s1616_s24 = smov %s1348_s25 }
 0x2b1   : > { %s1617_s25 = smov %s1352_s26  ;;  %s1618_s26 = smov %s1437_s10 }
 0x2b2   : > { %s1619_s27 = smov %s1426_s30  ;;  %19 = sbr.rel (!%p17_p2) target bundleno = 3 (0x3), region = 83 }
 0x2b7   :  { %949 = vsyncpa [#allocation3], 1 }
 0x2b8   :  { %951 = vsyncpa [#allocation3 + $0x1], 1 }

</bundles_post_ra>
